<compile_context>
chip_gen: v5e
topology: v5e:2x2
jax: 0.10.0
libtpu: 0.0.40
codegen_flags: <defaults>
</compile_context>

<pallas_src>
import jax
import jax.numpy as jnp
from jax.experimental import pallas as pl
from jax.experimental.pallas import tpu as pltpu

IN_F = 2
HIDDEN = 10
OUT_F = 1

LANE = 128
S_TILE = 64                  # batch sublanes per grid step
TB = S_TILE * LANE           # 8192 samples per grid step
N_PARAMS = IN_F * HIDDEN + HIDDEN + HIDDEN * OUT_F + OUT_F   # 41


def _mlp_kernel(params_ref, x_ref, o_ref):
    # params_ref: (41,) f32 in SMEM  [w1 row-major | b1 | w2 | b2]
    # x_ref:      (2, S_TILE, LANE) f32, batch mapped to (sublane, lane)
    # o_ref:      (S_TILE, LANE)    f32, lane-dense output slab
    x0 = x_ref[0]            # (S_TILE, LANE)
    x1 = x_ref[1]
    z = jnp.zeros_like(x0)
    for j in range(HIDDEN):                       # unrolled at trace time
        w_j0 = params_ref[2 * j]                  # fc1.weight[j, 0]
        w_j1 = params_ref[2 * j + 1]              # fc1.weight[j, 1]
        b_j = params_ref[2 * HIDDEN + j]          # fc1.bias[j]
        v_j = params_ref[3 * HIDDEN + j]          # fc2.weight[0, j]
        h_j = jnp.maximum(x0 * w_j0 + x1 * w_j1 + b_j, 0.0)   # ReLU(fc1)
        z = z + v_j * h_j
    z = z + params_ref[4 * HIDDEN]                # fc2.bias
    o_ref[...] = jax.nn.sigmoid(z)


def pack_params(w1, b1, w2, b2):
    """Flatten nn.Linear params once at init (weights are call-invariant)."""
    return jnp.concatenate([
        w1.astype(jnp.float32).reshape(-1),       # (20,) row-major: w1[j,0], w1[j,1]
        b1.astype(jnp.float32).reshape(-1),       # (10,)
        w2.astype(jnp.float32).reshape(-1),       # (10,)
        b2.astype(jnp.float32).reshape(-1),       # (1,)
    ])


@jax.jit
def net_forward(x, params):
    """x: (B, 2) f32, params: (41,) f32 -> (B, 1) f32 (== Net.forward)."""
    B = x.shape[0]
    b_pad = ((B + TB - 1) // TB) * TB
    n_sub = b_pad // LANE

    # Repack batch into lanes: sample b -> (sublane b//128, lane b%128).
    x_p = jnp.zeros((b_pad, IN_F), jnp.float32).at[:B, :].set(x.astype(jnp.float32))
    x_t = x_p.T.reshape(IN_F, n_sub, LANE)        # (2, n_sub, 128)

    out = pl.pallas_call(
        _mlp_kernel,
        out_shape=jax.ShapeDtypeStruct((n_sub, LANE), jnp.float32),
        grid_spec=pltpu.PrefetchScalarGridSpec(
            num_scalar_prefetch=0,
            grid=(b_pad // TB,),
            in_specs=[
                pl.BlockSpec(memory_space=pltpu.MemorySpace.SMEM),       # params
                pl.BlockSpec((IN_F, S_TILE, LANE), lambda i: (0, i, 0)),  # x tile
            ],
            out_specs=pl.BlockSpec((S_TILE, LANE), lambda i: (i, 0)),
        ),
        compiler_params=pltpu.CompilerParams(
            dimension_semantics=("parallel",)),
    )(params, x_t)

    return out.reshape(b_pad)[:B].reshape(B, OUT_F)


def _reference(x, w1, b1, w2, b2):
    h = jnp.maximum(x @ w1.T + b1, 0.0)
    return jax.nn.sigmoid(h @ w2.T + b2)


if __name__ == "__main__":
    key = jax.random.PRNGKey(0)
    kx, k1, k2, k3, k4 = jax.random.split(key, 5)

    # Deterministic params (shapes from nn.Linear(2,10), nn.Linear(10,1)).
    w1 = jax.random.normal(k1, (HIDDEN, IN_F), jnp.float32) * 0.5
    b1 = jax.random.normal(k2, (HIDDEN,), jnp.float32) * 0.1
    w2 = jax.random.normal(k3, (OUT_F, HIDDEN), jnp.float32) * 0.5
    b2 = jax.random.normal(k4, (OUT_F,), jnp.float32) * 0.1
    params = pack_params(w1, b1, w2, b2)          # done once at init

    ok = True
    for batch in (8, 200):                        # small sizes; exercises padding/slice
        x = jax.random.normal(kx, (batch, IN_F), jnp.float32)
        out = jax.block_until_ready(net_forward(x, params))
        ref = _reference(x, w1, b1, w2, b2)
        assert out.shape == (batch, OUT_F), out.shape
        assert jnp.allclose(out, ref, atol=1e-5, rtol=1e-5), (out, ref)

    if ok:
        print("KERNEL_OK")
</pallas_src>

<mosaic_0001>
module attributes {stable_mosaic.version = 11 : i64} {
  func.func @_mlp_kernel(%arg0: i32, %arg1: memref<41xf32, #tpu.memory_space<smem>>, %arg2: memref<2x64x128xf32, #tpu.memory_space<vmem>>, %arg3: memref<64x128xf32, #tpu.memory_space<vmem>>) attributes {dimension_semantics = [#tpu.dimension_semantics<parallel>], iteration_bounds = array<i64: 1>, scalar_prefetch = 0 : i64, scratch_operands = 0 : i64, tpu.core_type = #tpu.core_type<tc>, window_params = [{transform_indices = @transform_0, window_bounds = array<i64: 41>}, {transform_indices = @transform_1, window_bounds = array<i64: 2, 64, 128>}, {transform_indices = @transform_2, window_bounds = array<i64: 64, 128>}]} {
    %c0 = arith.constant 0 : index
    %c0_0 = arith.constant 0 : index
    %c0_1 = arith.constant 0 : index
    %0 = vector.load %arg2[%c0, %c0_0, %c0_1] : memref<2x64x128xf32, #tpu.memory_space<vmem>>, vector<1x64x128xf32>
    %1 = vector.shape_cast %0 : vector<1x64x128xf32> to vector<64x128xf32>
    %c1 = arith.constant 1 : index
    %c0_2 = arith.constant 0 : index
    %c0_3 = arith.constant 0 : index
    %2 = vector.load %arg2[%c1, %c0_2, %c0_3] : memref<2x64x128xf32, #tpu.memory_space<vmem>>, vector<1x64x128xf32>
    %3 = vector.shape_cast %2 : vector<1x64x128xf32> to vector<64x128xf32>
    %cst = arith.constant 0.000000e+00 : f32
    %4 = vector.broadcast %cst : f32 to vector<64x128xf32>
    %c0_4 = arith.constant 0 : index
    %5 = memref.load %arg1[%c0_4] : memref<41xf32, #tpu.memory_space<smem>>
    %c1_5 = arith.constant 1 : index
    %6 = memref.load %arg1[%c1_5] : memref<41xf32, #tpu.memory_space<smem>>
    %c20 = arith.constant 20 : index
    %7 = memref.load %arg1[%c20] : memref<41xf32, #tpu.memory_space<smem>>
    %c30 = arith.constant 30 : index
    %8 = memref.load %arg1[%c30] : memref<41xf32, #tpu.memory_space<smem>>
    %9 = vector.broadcast %5 : f32 to vector<64x128xf32>
    %10 = arith.mulf %1, %9 : vector<64x128xf32>
    %11 = vector.broadcast %6 : f32 to vector<64x128xf32>
    %12 = arith.mulf %3, %11 : vector<64x128xf32>
    %13 = arith.addf %10, %12 : vector<64x128xf32>
    %14 = vector.broadcast %7 : f32 to vector<64x128xf32>
    %15 = arith.addf %13, %14 : vector<64x128xf32>
    %cst_6 = arith.constant 0.000000e+00 : f32
    %16 = vector.broadcast %cst_6 : f32 to vector<64x128xf32>
    %17 = arith.maximumf %15, %16 : vector<64x128xf32>
    %18 = vector.broadcast %8 : f32 to vector<64x128xf32>
    %19 = arith.mulf %18, %17 : vector<64x128xf32>
    %20 = arith.addf %4, %19 : vector<64x128xf32>
    %c2 = arith.constant 2 : index
    %21 = memref.load %arg1[%c2] : memref<41xf32, #tpu.memory_space<smem>>
    %c3 = arith.constant 3 : index
    %22 = memref.load %arg1[%c3] : memref<41xf32, #tpu.memory_space<smem>>
    %c21 = arith.constant 21 : index
    %23 = memref.load %arg1[%c21] : memref<41xf32, #tpu.memory_space<smem>>
    %c31 = arith.constant 31 : index
    %24 = memref.load %arg1[%c31] : memref<41xf32, #tpu.memory_space<smem>>
    %25 = vector.broadcast %21 : f32 to vector<64x128xf32>
    %26 = arith.mulf %1, %25 : vector<64x128xf32>
    %27 = vector.broadcast %22 : f32 to vector<64x128xf32>
    %28 = arith.mulf %3, %27 : vector<64x128xf32>
    %29 = arith.addf %26, %28 : vector<64x128xf32>
    %30 = vector.broadcast %23 : f32 to vector<64x128xf32>
    %31 = arith.addf %29, %30 : vector<64x128xf32>
    %cst_7 = arith.constant 0.000000e+00 : f32
    %32 = vector.broadcast %cst_7 : f32 to vector<64x128xf32>
    %33 = arith.maximumf %31, %32 : vector<64x128xf32>
    %34 = vector.broadcast %24 : f32 to vector<64x128xf32>
    %35 = arith.mulf %34, %33 : vector<64x128xf32>
    %36 = arith.addf %20, %35 : vector<64x128xf32>
    %c4 = arith.constant 4 : index
    %37 = memref.load %arg1[%c4] : memref<41xf32, #tpu.memory_space<smem>>
    %c5 = arith.constant 5 : index
    %38 = memref.load %arg1[%c5] : memref<41xf32, #tpu.memory_space<smem>>
    %c22 = arith.constant 22 : index
    %39 = memref.load %arg1[%c22] : memref<41xf32, #tpu.memory_space<smem>>
    %c32 = arith.constant 32 : index
    %40 = memref.load %arg1[%c32] : memref<41xf32, #tpu.memory_space<smem>>
    %41 = vector.broadcast %37 : f32 to vector<64x128xf32>
    %42 = arith.mulf %1, %41 : vector<64x128xf32>
    %43 = vector.broadcast %38 : f32 to vector<64x128xf32>
    %44 = arith.mulf %3, %43 : vector<64x128xf32>
    %45 = arith.addf %42, %44 : vector<64x128xf32>
    %46 = vector.broadcast %39 : f32 to vector<64x128xf32>
    %47 = arith.addf %45, %46 : vector<64x128xf32>
    %cst_8 = arith.constant 0.000000e+00 : f32
    %48 = vector.broadcast %cst_8 : f32 to vector<64x128xf32>
    %49 = arith.maximumf %47, %48 : vector<64x128xf32>
    %50 = vector.broadcast %40 : f32 to vector<64x128xf32>
    %51 = arith.mulf %50, %49 : vector<64x128xf32>
    %52 = arith.addf %36, %51 : vector<64x128xf32>
    %c6 = arith.constant 6 : index
    %53 = memref.load %arg1[%c6] : memref<41xf32, #tpu.memory_space<smem>>
    %c7 = arith.constant 7 : index
    %54 = memref.load %arg1[%c7] : memref<41xf32, #tpu.memory_space<smem>>
    %c23 = arith.constant 23 : index
    %55 = memref.load %arg1[%c23] : memref<41xf32, #tpu.memory_space<smem>>
    %c33 = arith.constant 33 : index
    %56 = memref.load %arg1[%c33] : memref<41xf32, #tpu.memory_space<smem>>
    %57 = vector.broadcast %53 : f32 to vector<64x128xf32>
    %58 = arith.mulf %1, %57 : vector<64x128xf32>
    %59 = vector.broadcast %54 : f32 to vector<64x128xf32>
    %60 = arith.mulf %3, %59 : vector<64x128xf32>
    %61 = arith.addf %58, %60 : vector<64x128xf32>
    %62 = vector.broadcast %55 : f32 to vector<64x128xf32>
    %63 = arith.addf %61, %62 : vector<64x128xf32>
    %cst_9 = arith.constant 0.000000e+00 : f32
    %64 = vector.broadcast %cst_9 : f32 to vector<64x128xf32>
    %65 = arith.maximumf %63, %64 : vector<64x128xf32>
    %66 = vector.broadcast %56 : f32 to vector<64x128xf32>
    %67 = arith.mulf %66, %65 : vector<64x128xf32>
    %68 = arith.addf %52, %67 : vector<64x128xf32>
    %c8 = arith.constant 8 : index
    %69 = memref.load %arg1[%c8] : memref<41xf32, #tpu.memory_space<smem>>
    %c9 = arith.constant 9 : index
    %70 = memref.load %arg1[%c9] : memref<41xf32, #tpu.memory_space<smem>>
    %c24 = arith.constant 24 : index
    %71 = memref.load %arg1[%c24] : memref<41xf32, #tpu.memory_space<smem>>
    %c34 = arith.constant 34 : index
    %72 = memref.load %arg1[%c34] : memref<41xf32, #tpu.memory_space<smem>>
    %73 = vector.broadcast %69 : f32 to vector<64x128xf32>
    %74 = arith.mulf %1, %73 : vector<64x128xf32>
    %75 = vector.broadcast %70 : f32 to vector<64x128xf32>
    %76 = arith.mulf %3, %75 : vector<64x128xf32>
    %77 = arith.addf %74, %76 : vector<64x128xf32>
    %78 = vector.broadcast %71 : f32 to vector<64x128xf32>
    %79 = arith.addf %77, %78 : vector<64x128xf32>
    %cst_10 = arith.constant 0.000000e+00 : f32
    %80 = vector.broadcast %cst_10 : f32 to vector<64x128xf32>
    %81 = arith.maximumf %79, %80 : vector<64x128xf32>
    %82 = vector.broadcast %72 : f32 to vector<64x128xf32>
    %83 = arith.mulf %82, %81 : vector<64x128xf32>
    %84 = arith.addf %68, %83 : vector<64x128xf32>
    %c10 = arith.constant 10 : index
    %85 = memref.load %arg1[%c10] : memref<41xf32, #tpu.memory_space<smem>>
    %c11 = arith.constant 11 : index
    %86 = memref.load %arg1[%c11] : memref<41xf32, #tpu.memory_space<smem>>
    %c25 = arith.constant 25 : index
    %87 = memref.load %arg1[%c25] : memref<41xf32, #tpu.memory_space<smem>>
    %c35 = arith.constant 35 : index
    %88 = memref.load %arg1[%c35] : memref<41xf32, #tpu.memory_space<smem>>
    %89 = vector.broadcast %85 : f32 to vector<64x128xf32>
    %90 = arith.mulf %1, %89 : vector<64x128xf32>
    %91 = vector.broadcast %86 : f32 to vector<64x128xf32>
    %92 = arith.mulf %3, %91 : vector<64x128xf32>
    %93 = arith.addf %90, %92 : vector<64x128xf32>
    %94 = vector.broadcast %87 : f32 to vector<64x128xf32>
    %95 = arith.addf %93, %94 : vector<64x128xf32>
    %cst_11 = arith.constant 0.000000e+00 : f32
    %96 = vector.broadcast %cst_11 : f32 to vector<64x128xf32>
    %97 = arith.maximumf %95, %96 : vector<64x128xf32>
    %98 = vector.broadcast %88 : f32 to vector<64x128xf32>
    %99 = arith.mulf %98, %97 : vector<64x128xf32>
    %100 = arith.addf %84, %99 : vector<64x128xf32>
    %c12 = arith.constant 12 : index
    %101 = memref.load %arg1[%c12] : memref<41xf32, #tpu.memory_space<smem>>
    %c13 = arith.constant 13 : index
    %102 = memref.load %arg1[%c13] : memref<41xf32, #tpu.memory_space<smem>>
    %c26 = arith.constant 26 : index
    %103 = memref.load %arg1[%c26] : memref<41xf32, #tpu.memory_space<smem>>
    %c36 = arith.constant 36 : index
    %104 = memref.load %arg1[%c36] : memref<41xf32, #tpu.memory_space<smem>>
    %105 = vector.broadcast %101 : f32 to vector<64x128xf32>
    %106 = arith.mulf %1, %105 : vector<64x128xf32>
    %107 = vector.broadcast %102 : f32 to vector<64x128xf32>
    %108 = arith.mulf %3, %107 : vector<64x128xf32>
    %109 = arith.addf %106, %108 : vector<64x128xf32>
    %110 = vector.broadcast %103 : f32 to vector<64x128xf32>
    %111 = arith.addf %109, %110 : vector<64x128xf32>
    %cst_12 = arith.constant 0.000000e+00 : f32
    %112 = vector.broadcast %cst_12 : f32 to vector<64x128xf32>
    %113 = arith.maximumf %111, %112 : vector<64x128xf32>
    %114 = vector.broadcast %104 : f32 to vector<64x128xf32>
    %115 = arith.mulf %114, %113 : vector<64x128xf32>
    %116 = arith.addf %100, %115 : vector<64x128xf32>
    %c14 = arith.constant 14 : index
    %117 = memref.load %arg1[%c14] : memref<41xf32, #tpu.memory_space<smem>>
    %c15 = arith.constant 15 : index
    %118 = memref.load %arg1[%c15] : memref<41xf32, #tpu.memory_space<smem>>
    %c27 = arith.constant 27 : index
    %119 = memref.load %arg1[%c27] : memref<41xf32, #tpu.memory_space<smem>>
    %c37 = arith.constant 37 : index
    %120 = memref.load %arg1[%c37] : memref<41xf32, #tpu.memory_space<smem>>
    %121 = vector.broadcast %117 : f32 to vector<64x128xf32>
    %122 = arith.mulf %1, %121 : vector<64x128xf32>
    %123 = vector.broadcast %118 : f32 to vector<64x128xf32>
    %124 = arith.mulf %3, %123 : vector<64x128xf32>
    %125 = arith.addf %122, %124 : vector<64x128xf32>
    %126 = vector.broadcast %119 : f32 to vector<64x128xf32>
    %127 = arith.addf %125, %126 : vector<64x128xf32>
    %cst_13 = arith.constant 0.000000e+00 : f32
    %128 = vector.broadcast %cst_13 : f32 to vector<64x128xf32>
    %129 = arith.maximumf %127, %128 : vector<64x128xf32>
    %130 = vector.broadcast %120 : f32 to vector<64x128xf32>
    %131 = arith.mulf %130, %129 : vector<64x128xf32>
    %132 = arith.addf %116, %131 : vector<64x128xf32>
    %c16 = arith.constant 16 : index
    %133 = memref.load %arg1[%c16] : memref<41xf32, #tpu.memory_space<smem>>
    %c17 = arith.constant 17 : index
    %134 = memref.load %arg1[%c17] : memref<41xf32, #tpu.memory_space<smem>>
    %c28 = arith.constant 28 : index
    %135 = memref.load %arg1[%c28] : memref<41xf32, #tpu.memory_space<smem>>
    %c38 = arith.constant 38 : index
    %136 = memref.load %arg1[%c38] : memref<41xf32, #tpu.memory_space<smem>>
    %137 = vector.broadcast %133 : f32 to vector<64x128xf32>
    %138 = arith.mulf %1, %137 : vector<64x128xf32>
    %139 = vector.broadcast %134 : f32 to vector<64x128xf32>
    %140 = arith.mulf %3, %139 : vector<64x128xf32>
    %141 = arith.addf %138, %140 : vector<64x128xf32>
    %142 = vector.broadcast %135 : f32 to vector<64x128xf32>
    %143 = arith.addf %141, %142 : vector<64x128xf32>
    %cst_14 = arith.constant 0.000000e+00 : f32
    %144 = vector.broadcast %cst_14 : f32 to vector<64x128xf32>
    %145 = arith.maximumf %143, %144 : vector<64x128xf32>
    %146 = vector.broadcast %136 : f32 to vector<64x128xf32>
    %147 = arith.mulf %146, %145 : vector<64x128xf32>
    %148 = arith.addf %132, %147 : vector<64x128xf32>
    %c18 = arith.constant 18 : index
    %149 = memref.load %arg1[%c18] : memref<41xf32, #tpu.memory_space<smem>>
    %c19 = arith.constant 19 : index
    %150 = memref.load %arg1[%c19] : memref<41xf32, #tpu.memory_space<smem>>
    %c29 = arith.constant 29 : index
    %151 = memref.load %arg1[%c29] : memref<41xf32, #tpu.memory_space<smem>>
    %c39 = arith.constant 39 : index
    %152 = memref.load %arg1[%c39] : memref<41xf32, #tpu.memory_space<smem>>
    %153 = vector.broadcast %149 : f32 to vector<64x128xf32>
    %154 = arith.mulf %1, %153 : vector<64x128xf32>
    %155 = vector.broadcast %150 : f32 to vector<64x128xf32>
    %156 = arith.mulf %3, %155 : vector<64x128xf32>
    %157 = arith.addf %154, %156 : vector<64x128xf32>
    %158 = vector.broadcast %151 : f32 to vector<64x128xf32>
    %159 = arith.addf %157, %158 : vector<64x128xf32>
    %cst_15 = arith.constant 0.000000e+00 : f32
    %160 = vector.broadcast %cst_15 : f32 to vector<64x128xf32>
    %161 = arith.maximumf %159, %160 : vector<64x128xf32>
    %162 = vector.broadcast %152 : f32 to vector<64x128xf32>
    %163 = arith.mulf %162, %161 : vector<64x128xf32>
    %164 = arith.addf %148, %163 : vector<64x128xf32>
    %c40 = arith.constant 40 : index
    %165 = memref.load %arg1[%c40] : memref<41xf32, #tpu.memory_space<smem>>
    %166 = vector.broadcast %165 : f32 to vector<64x128xf32>
    %167 = arith.addf %164, %166 : vector<64x128xf32>
    %168 = arith.negf %167 : vector<64x128xf32>
    %169 = math.exp %168 : vector<64x128xf32>
    %cst_16 = arith.constant 1.000000e+00 : f32
    %170 = vector.broadcast %cst_16 : f32 to vector<64x128xf32>
    %171 = arith.addf %170, %169 : vector<64x128xf32>
    %172 = arith.divf %170, %171 : vector<64x128xf32>
    %c0_17 = arith.constant 0 : index
    %c0_18 = arith.constant 0 : index
    %173 = vector.load %arg3[%c0_17, %c0_18] : memref<64x128xf32, #tpu.memory_space<vmem>>, vector<64x128xf32>
    tpu.vector_store %arg3[%c0_17, %c0_18], %172 {strides = array<i32>} : memref<64x128xf32, #tpu.memory_space<vmem>>, vector<64x128xf32>,
    return
  }
  func.func @transform_0(%arg0: i32) -> i32 {
    %c0_i32 = arith.constant 0 : i32
    %c0_i32_0 = arith.constant 0 : i32
    return %c0_i32 : i32
  }
  func.func @transform_1(%arg0: i32) -> (i32, i32, i32) {
    %c0_i32 = arith.constant 0 : i32
    %c0_i32_0 = arith.constant 0 : i32
    %c0_i32_1 = arith.constant 0 : i32
    return %c0_i32, %arg0, %c0_i32_0 : i32, i32, i32
  }
  func.func @transform_2(%arg0: i32) -> (i32, i32) {
    %c0_i32 = arith.constant 0 : i32
    %c0_i32_0 = arith.constant 0 : i32
    return %arg0, %c0_i32 : i32, i32
  }
}

</mosaic_0001>

<bundles_post_ra>
// kernel: net_forward.1
= control target key start
LH: loop header
LB: loop body
LE: loop exit
PB: predicated region body
PF: predicated region fallthrough
CT: control target
= control target key end

     0   :  { %7 = vsyncpa [#allocation3], 0  ;;  %s975_s12 = smov [#allocation2]   ;;  %s1762_s0 = inlined_call_operand.vmem [shape: f32[41], index: 0, kind: input, shape index: {}]   ;;  %s1763_s1 = inlined_call_operand.vmem [shape: f32[2,64,128], index: 1, kind: input, shape index: {}]   ;;  %s1764_s2 = inlined_call_operand.vmem [shape: f32[64,128], index: 2, kind: output, shape index: {}]  }
   0x1   :  { %s13_s11 = sshll.u32 %s1762_s0, 4  ;;  %s14_s11 = int_to_ptr.vmem [resolvable:$true] %s13_s11 }
   0x2   :  { %16 = dma.vmem_to_smem %s14_s11, 16, %s975_s12, [#allocation3]  }
   0x3   :  { %973 = dma.done.wait [#allocation3], 16  }
   0x4   :  { %974 = vsyncadd [#allocation3], 4294967280 }
   0x5   :  { %23 = sfence }
   0x6   :  { %s41_s13 = sld [smem:[#allocation2]]  ;;  %v997_v0 = vld [vmem:[%s1763_s1] sm:$0xff]  ;;  %v1002_v1 = vld [vmem:[%s1763_s1 + $0x8] sm:$0xff]  ;;  %v1007_v2 = vld [vmem:[%s1763_s1 + $0x10] sm:$0xff] }
   0x7   :  { %s864_s14 = sld [smem:[#allocation2 + $0x1]]  ;;  %v1012_v3 = vld [vmem:[%s1763_s1 + $0x18] sm:$0xff]  ;;  %v1017_v4 = vld [vmem:[%s1763_s1 + $0x20] sm:$0xff]  ;;  %v1022_v5 = vld [vmem:[%s1763_s1 + $0x28] sm:$0xff] }
   0x8   :  { %s865_s15 = sld [smem:[#allocation2 + $0x14]]  ;;  %v1027_v6 = vld [vmem:[%s1763_s1 + $0x30] sm:$0xff]  ;;  %v1032_v7 = vld [vmem:[%s1763_s1 + $0x38] sm:$0xff]  ;;  %v1037_v8 = vld [vmem:[%s1763_s1 + $0x40] sm:$0xff] }
   0x9   :  { %s866_s18 = sld [smem:[#allocation2 + $0x1e]]  ;;  %v1042_v9 = vld [vmem:[%s1763_s1 + $0x48] sm:$0xff]  ;;  %v1047_v11 = vld [vmem:[%s1763_s1 + $0x50] sm:$0xff]  ;;  %v1052_v12 = vld [vmem:[%s1763_s1 + $0x58] sm:$0xff] }
   0xa   :  { %v1057_v13 = vld [vmem:[%s1763_s1 + $0x60] sm:$0xff]  ;;  %v1065_v17 = vld [vmem:[%s1763_s1 + $0x68] sm:$0xff]  ;;  %v1070_v18 = vld [vmem:[%s1763_s1 + $0x70] sm:$0xff]  ;;  %s1082_s22 = sld [smem:[#allocation2 + $0x2]] }
   0xb   :  { %v1075_v19 = vld [vmem:[%s1763_s1 + $0x78] sm:$0xff]  ;;  %s1088_s23 = sld [smem:[#allocation2 + $0x3]] }
   0xc   :  { %v45_v10 = vstv %s41_s13  ;;  %s1136_s24 = sld [smem:[#allocation2 + $0x5]] }
   0xd   :  { %v46_v14 = vmul.f32 %v45_v10, %v997_v0  ;;  %v47_v15 = vmul.f32 %v45_v10, %v1002_v1  ;;  %v48_v16 = vmul.f32 %v45_v10, %v1007_v2  ;;  %v49_v20 = vmul.f32 %v45_v10, %v1012_v3  ;;  %s1138_s25 = sld [smem:[#allocation2 + $0x16]] }
   0xe   :  { %v50_v21 = vmul.f32 %v45_v10, %v1017_v4  ;;  %v51_v22 = vmul.f32 %v45_v10, %v1022_v5  ;;  %v52_v23 = vmul.f32 %v45_v10, %v1027_v6  ;;  %v53_v24 = vmul.f32 %v45_v10, %v1032_v7  ;;  %s1140_s26 = sld [smem:[#allocation2 + $0x20]] }
   0xf   :  { %v54_v25 = vstv %s864_s14  ;;  %v71_v26 = vstv %s865_s15  ;;  %v88_v27 = vstv %s866_s18  ;;  %s1094_s14 = sld [smem:[#allocation2 + $0x15]] }
  0x10   :  { %v55_v28 = vmul.f32 %v1037_v8, %v54_v25  ;;  %v56_v29 = vmul.f32 %v1042_v9, %v54_v25  ;;  %v57_v30 = vmul.f32 %v1047_v11, %v54_v25  ;;  %v58_v31 = vmul.f32 %v1052_v12, %v54_v25  ;;  %s1096_s15 = sld [smem:[#allocation2 + $0x1f]] }
  0x11   :  { %v59_v32 = vmul.f32 %v1057_v13, %v54_v25  ;;  %v60_v33 = vmul.f32 %v1065_v17, %v54_v25  ;;  %v61_v34 = vmul.f32 %v1070_v18, %v54_v25  ;;  %v62_v35 = vmul.f32 %v1075_v19, %v54_v25  ;;  %s1134_s18 = sld [smem:[#allocation2 + $0x4]] }
  0x12   :  { %v63_v36 = vadd.f32 %v55_v28, %v46_v14  ;;  %v64_v37 = vadd.f32 %v56_v29, %v47_v15  ;;  %v65_v38 = vadd.f32 %v57_v30, %v48_v16  ;;  %v66_v39 = vadd.f32 %v58_v31, %v49_v20  ;;  %s1186_s27 = sld [smem:[#allocation2 + $0x6]] }
  0x13   :  { %v67_v40 = vadd.f32 %v59_v32, %v50_v21  ;;  %v68_v41 = vadd.f32 %v60_v33, %v51_v22  ;;  %v69_v42 = vadd.f32 %v61_v34, %v52_v23  ;;  %v70_v43 = vadd.f32 %v62_v35, %v53_v24  ;;  %s1188_s28 = sld [smem:[#allocation2 + $0x7]] }
  0x14   :  { %v72_v44 = vadd.f32 %v71_v26, %v63_v36  ;;  %v73_v45 = vadd.f32 %v71_v26, %v64_v37  ;;  %v74_v46 = vadd.f32 %v71_v26, %v65_v38  ;;  %v75_v47 = vadd.f32 %v71_v26, %v66_v39  ;;  %s1190_s29 = sld [smem:[#allocation2 + $0x17]] }
  0x15   :  { %v76_v48 = vadd.f32 %v71_v26, %v67_v40  ;;  %v77_v49 = vadd.f32 %v71_v26, %v68_v41  ;;  %v78_v50 = vadd.f32 %v71_v26, %v69_v42  ;;  %v79_v51 = vadd.f32 %v71_v26, %v70_v43  ;;  %s1192_s30 = sld [smem:[#allocation2 + $0x21]] }
  0x16   :  { %v80_v52 = vmax.f32 %v72_v44, 0.0  ;;  %v81_v53 = vmax.f32 %v73_v45, 0.0  ;;  %v82_v54 = vmax.f32 %v74_v46, 0.0  ;;  %v83_v55 = vmax.f32 %v75_v47, 0.0  ;;  %s1238_s3 = sld [smem:[#allocation2 + $0x8]] }
  0x17   :  { %v84_v56 = vmax.f32 %v76_v48, 0.0  ;;  %v85_v57 = vmax.f32 %v77_v49, 0.0  ;;  %v86_v58 = vmax.f32 %v78_v50, 0.0  ;;  %v87_v59 = vmax.f32 %v79_v51, 0.0  ;;  %s1240_s4 = sld [smem:[#allocation2 + $0x9]] }
  0x18   :  { %v1098_v60 = vmul.f32 %v88_v27, %v80_v52  ;;  %v1100_v61 = vmul.f32 %v88_v27, %v81_v53  ;;  %v1102_v62 = vmul.f32 %v88_v27, %v82_v54  ;;  %v1104_v63 = vmul.f32 %v88_v27, %v83_v55  ;;  %s1242_s5 = sld [smem:[#allocation2 + $0x18]] }
  0x19   :  { %v1106_v10 = vmul.f32 %v88_v27, %v84_v56  ;;  %v1108_v14 = vmul.f32 %v88_v27, %v85_v57  ;;  %v1110_v15 = vmul.f32 %v88_v27, %v86_v58  ;;  %v1112_v16 = vmul.f32 %v88_v27, %v87_v59  ;;  %s1244_s6 = sld [smem:[#allocation2 + $0x22]] }
  0x1a   :  { %v109_v20 = vstv %s1082_s22  ;;  %v118_v21 = vstv %s1088_s23  ;;  %v135_v22 = vstv %s1094_s14  ;;  %v152_v23 = vstv %s1096_s15  ;;  %s1290_s7 = sld [smem:[#allocation2 + $0xa]] }
  0x1b   :  { %v110_v24 = vmul.f32 %v109_v20, %v997_v0  ;;  %v111_v25 = vmul.f32 %v109_v20, %v1002_v1  ;;  %v112_v26 = vmul.f32 %v109_v20, %v1007_v2  ;;  %v113_v28 = vmul.f32 %v109_v20, %v1012_v3  ;;  %s1292_s8 = sld [smem:[#allocation2 + $0xb]] }
  0x1c   :  { %v114_v29 = vmul.f32 %v109_v20, %v1017_v4  ;;  %v115_v30 = vmul.f32 %v109_v20, %v1022_v5  ;;  %v116_v31 = vmul.f32 %v109_v20, %v1027_v6  ;;  %v117_v27 = vmul.f32 %v109_v20, %v1032_v7  ;;  %s1294_s9 = sld [smem:[#allocation2 + $0x19]] }
  0x1d   :  { %v119_v32 = vmul.f32 %v1037_v8, %v118_v21  ;;  %v120_v33 = vmul.f32 %v1042_v9, %v118_v21  ;;  %v121_v34 = vmul.f32 %v1047_v11, %v118_v21  ;;  %v122_v35 = vmul.f32 %v1052_v12, %v118_v21  ;;  %s1296_s10 = sld [smem:[#allocation2 + $0x23]] }
  0x1e   :  { %v123_v36 = vmul.f32 %v1057_v13, %v118_v21  ;;  %v124_v37 = vmul.f32 %v1065_v17, %v118_v21  ;;  %v125_v38 = vmul.f32 %v1070_v18, %v118_v21  ;;  %v126_v39 = vmul.f32 %v1075_v19, %v118_v21  ;;  %s1342_s11 = sld [smem:[#allocation2 + $0xc]] }
  0x1f   :  { %v127_v40 = vadd.f32 %v119_v32, %v110_v24  ;;  %v128_v41 = vadd.f32 %v120_v33, %v111_v25  ;;  %v129_v42 = vadd.f32 %v121_v34, %v112_v26  ;;  %v130_v43 = vadd.f32 %v122_v35, %v113_v28  ;;  %s1344_s12 = sld [smem:[#allocation2 + $0xd]] }
  0x20   :  { %v131_v44 = vadd.f32 %v123_v36, %v114_v29  ;;  %v132_v45 = vadd.f32 %v124_v37, %v115_v30  ;;  %v133_v46 = vadd.f32 %v125_v38, %v116_v31  ;;  %v134_v47 = vadd.f32 %v126_v39, %v117_v27  ;;  %s1346_s16 = sld [smem:[#allocation2 + $0x1a]] }
  0x21   :  { %v136_v48 = vadd.f32 %v135_v22, %v127_v40  ;;  %v137_v49 = vadd.f32 %v135_v22, %v128_v41  ;;  %v138_v50 = vadd.f32 %v135_v22, %v129_v42  ;;  %v139_v51 = vadd.f32 %v135_v22, %v130_v43  ;;  %s1348_s13 = sld [smem:[#allocation2 + $0x24]] }
  0x22   :  { %v140_v52 = vadd.f32 %v135_v22, %v131_v44  ;;  %v141_v53 = vadd.f32 %v135_v22, %v132_v45  ;;  %v142_v54 = vadd.f32 %v135_v22, %v133_v46  ;;  %v143_v55 = vadd.f32 %v135_v22, %v134_v47  ;;  %s1394_s17 = sld [smem:[#allocation2 + $0xe]] }
  0x23   :  { %v144_v56 = vmax.f32 %v136_v48, 0.0  ;;  %v145_v57 = vmax.f32 %v137_v49, 0.0  ;;  %v146_v58 = vmax.f32 %v138_v50, 0.0  ;;  %v147_v59 = vmax.f32 %v139_v51, 0.0  ;;  %s1396_s19 = sld [smem:[#allocation2 + $0xf]] }
  0x24   :  { %v148_v20 = vmax.f32 %v140_v52, 0.0  ;;  %v149_v21 = vmax.f32 %v141_v53, 0.0  ;;  %v150_v24 = vmax.f32 %v142_v54, 0.0  ;;  %v151_v25 = vmax.f32 %v143_v55, 0.0  ;;  %s1398_s20 = sld [smem:[#allocation2 + $0x1b]] }
  0x25   :  { %v153_v26 = vmul.f32 %v152_v23, %v144_v56  ;;  %v154_v28 = vmul.f32 %v152_v23, %v145_v57  ;;  %v155_v29 = vmul.f32 %v152_v23, %v146_v58  ;;  %v156_v30 = vmul.f32 %v152_v23, %v147_v59  ;;  %s1400_s0 = sld [smem:[#allocation2 + $0x25]] }
  0x26   :  { %v157_v31 = vmul.f32 %v152_v23, %v148_v20  ;;  %v158_v27 = vmul.f32 %v152_v23, %v149_v21  ;;  %v159_v32 = vmul.f32 %v152_v23, %v150_v24  ;;  %v160_v22 = vmul.f32 %v152_v23, %v151_v25  ;;  %s1446_s21 = sld [smem:[#allocation2 + $0x10]] }
  0x27   :  { %v1143_v33 = vadd.f32 %v153_v26, %v1098_v60  ;;  %v1146_v34 = vadd.f32 %v154_v28, %v1100_v61  ;;  %v1149_v35 = vadd.f32 %v155_v29, %v1102_v62  ;;  %v1152_v36 = vadd.f32 %v156_v30, %v1104_v63  ;;  %s1448_s22 = sld [smem:[#allocation2 + $0x11]] }
  0x28   :  { %v1155_v37 = vadd.f32 %v157_v31, %v1106_v10  ;;  %v1158_v38 = vadd.f32 %v158_v27, %v1108_v14  ;;  %v1161_v23 = vadd.f32 %v159_v32, %v1110_v15  ;;  %v1164_v60 = vadd.f32 %v160_v22, %v1112_v16  ;;  %s1450_s23 = sld [smem:[#allocation2 + $0x1c]] }
  0x29   :  { %v173_v61 = vstv %s1134_s18  ;;  %v182_v39 = vstv %s1136_s24  ;;  %v199_v40 = vstv %s1138_s25  ;;  %v216_v62 = vstv %s1140_s26  ;;  %s1452_s14 = sld [smem:[#allocation2 + $0x26]] }
  0x2a   :  { %v174_v41 = vmul.f32 %v173_v61, %v997_v0  ;;  %v175_v63 = vmul.f32 %v173_v61, %v1002_v1  ;;  %v176_v10 = vmul.f32 %v173_v61, %v1007_v2  ;;  %v177_v42 = vmul.f32 %v173_v61, %v1012_v3  ;;  %s1580_s25 = sld [smem:[#allocation2 + $0x12]] }
  0x2b   :  { %v178_v14 = vmul.f32 %v173_v61, %v1017_v4  ;;  %v179_v15 = vmul.f32 %v173_v61, %v1022_v5  ;;  %v180_v43 = vmul.f32 %v173_v61, %v1027_v6  ;;  %v181_v16 = vmul.f32 %v173_v61, %v1032_v7  ;;  %s1582_s26 = sld [smem:[#allocation2 + $0x13]] }
  0x2c   :  { %v183_v44 = vmul.f32 %v1037_v8, %v182_v39  ;;  %v184_v45 = vmul.f32 %v1042_v9, %v182_v39  ;;  %v185_v46 = vmul.f32 %v1047_v11, %v182_v39  ;;  %v186_v47 = vmul.f32 %v1052_v12, %v182_v39 }
  0x2d   :  { %v187_v48 = vmul.f32 %v1057_v13, %v182_v39  ;;  %v188_v49 = vmul.f32 %v1065_v17, %v182_v39  ;;  %v189_v50 = vmul.f32 %v1070_v18, %v182_v39  ;;  %v190_v51 = vmul.f32 %v1075_v19, %v182_v39 }
  0x2e   :  { %v191_v52 = vadd.f32 %v183_v44, %v174_v41  ;;  %v192_v53 = vadd.f32 %v184_v45, %v175_v63  ;;  %v193_v54 = vadd.f32 %v185_v46, %v176_v10  ;;  %v194_v55 = vadd.f32 %v186_v47, %v177_v42 }
  0x2f   :  { %v195_v56 = vadd.f32 %v187_v48, %v178_v14  ;;  %v196_v57 = vadd.f32 %v188_v49, %v179_v15  ;;  %v197_v58 = vadd.f32 %v189_v50, %v180_v43  ;;  %v198_v59 = vadd.f32 %v190_v51, %v181_v16 }
  0x30   :  { %v200_v20 = vadd.f32 %v199_v40, %v191_v52  ;;  %v201_v21 = vadd.f32 %v199_v40, %v192_v53  ;;  %v202_v24 = vadd.f32 %v199_v40, %v193_v54  ;;  %v203_v25 = vadd.f32 %v199_v40, %v194_v55 }
  0x31   :  { %v204_v26 = vadd.f32 %v199_v40, %v195_v56  ;;  %v205_v28 = vadd.f32 %v199_v40, %v196_v57  ;;  %v206_v29 = vadd.f32 %v199_v40, %v197_v58  ;;  %v207_v30 = vadd.f32 %v199_v40, %v198_v59 }
  0x32   :  { %v208_v31 = vmax.f32 %v200_v20, 0.0  ;;  %v209_v27 = vmax.f32 %v201_v21, 0.0  ;;  %v210_v32 = vmax.f32 %v202_v24, 0.0  ;;  %v211_v22 = vmax.f32 %v203_v25, 0.0 }
  0x33   :  { %v212_v61 = vmax.f32 %v204_v26, 0.0  ;;  %v213_v39 = vmax.f32 %v205_v28, 0.0  ;;  %v214_v41 = vmax.f32 %v206_v29, 0.0  ;;  %v215_v63 = vmax.f32 %v207_v30, 0.0 }
  0x34   :  { %v217_v10 = vmul.f32 %v216_v62, %v208_v31  ;;  %v218_v42 = vmul.f32 %v216_v62, %v209_v27  ;;  %v219_v14 = vmul.f32 %v216_v62, %v210_v32  ;;  %v220_v15 = vmul.f32 %v216_v62, %v211_v22 }
  0x35   :  { %v221_v43 = vmul.f32 %v216_v62, %v212_v61  ;;  %v222_v16 = vmul.f32 %v216_v62, %v213_v39  ;;  %v223_v44 = vmul.f32 %v216_v62, %v214_v41  ;;  %v224_v40 = vmul.f32 %v216_v62, %v215_v63 }
  0x36   :  { %v1195_v45 = vadd.f32 %v217_v10, %v1143_v33  ;;  %v1198_v46 = vadd.f32 %v218_v42, %v1146_v34  ;;  %v1201_v47 = vadd.f32 %v219_v14, %v1149_v35  ;;  %v1204_v48 = vadd.f32 %v220_v15, %v1152_v36 }
  0x37   :  { %v1207_v49 = vadd.f32 %v221_v43, %v1155_v37  ;;  %v1210_v50 = vadd.f32 %v222_v16, %v1158_v38  ;;  %v1213_v62 = vadd.f32 %v223_v44, %v1161_v23  ;;  %v1216_v33 = vadd.f32 %v224_v40, %v1164_v60 }
  0x38   :  { %v237_v34 = vstv %s1186_s27  ;;  %v246_v51 = vstv %s1188_s28  ;;  %v263_v52 = vstv %s1190_s29  ;;  %v280_v35 = vstv %s1192_s30  ;;  %s1584_s27 = sld [smem:[#allocation2 + $0x1d]] }
  0x39   :  { %v238_v53 = vmul.f32 %v237_v34, %v997_v0  ;;  %v239_v36 = vmul.f32 %v237_v34, %v1002_v1  ;;  %v240_v37 = vmul.f32 %v237_v34, %v1007_v2  ;;  %v241_v54 = vmul.f32 %v237_v34, %v1012_v3  ;;  %s903_s28 = sld [smem:[#allocation2 + $0x28]] }
  0x3a   :  { %v242_v38 = vmul.f32 %v237_v34, %v1017_v4  ;;  %v243_v23 = vmul.f32 %v237_v34, %v1022_v5  ;;  %v244_v55 = vmul.f32 %v237_v34, %v1027_v6  ;;  %v245_v60 = vmul.f32 %v237_v34, %v1032_v7 }
  0x3b   :  { %v247_v56 = vmul.f32 %v1037_v8, %v246_v51  ;;  %v248_v57 = vmul.f32 %v1042_v9, %v246_v51  ;;  %v249_v58 = vmul.f32 %v1047_v11, %v246_v51  ;;  %v250_v59 = vmul.f32 %v1052_v12, %v246_v51 }
  0x3c   :  { %v251_v20 = vmul.f32 %v1057_v13, %v246_v51  ;;  %v252_v21 = vmul.f32 %v1065_v17, %v246_v51  ;;  %v253_v24 = vmul.f32 %v1070_v18, %v246_v51  ;;  %v254_v25 = vmul.f32 %v1075_v19, %v246_v51 }
  0x3d   :  { %v255_v26 = vadd.f32 %v247_v56, %v238_v53  ;;  %v256_v28 = vadd.f32 %v248_v57, %v239_v36  ;;  %v257_v29 = vadd.f32 %v249_v58, %v240_v37  ;;  %v258_v30 = vadd.f32 %v250_v59, %v241_v54 }
  0x3e   :  { %v259_v31 = vadd.f32 %v251_v20, %v242_v38  ;;  %v260_v27 = vadd.f32 %v252_v21, %v243_v23  ;;  %v261_v32 = vadd.f32 %v253_v24, %v244_v55  ;;  %v262_v22 = vadd.f32 %v254_v25, %v245_v60 }
  0x3f   :  { %v264_v61 = vadd.f32 %v263_v52, %v255_v26  ;;  %v265_v39 = vadd.f32 %v263_v52, %v256_v28  ;;  %v266_v41 = vadd.f32 %v263_v52, %v257_v29  ;;  %v267_v63 = vadd.f32 %v263_v52, %v258_v30 }
  0x40   :  { %v268_v10 = vadd.f32 %v263_v52, %v259_v31  ;;  %v269_v42 = vadd.f32 %v263_v52, %v260_v27  ;;  %v270_v14 = vadd.f32 %v263_v52, %v261_v32  ;;  %v271_v15 = vadd.f32 %v263_v52, %v262_v22 }
  0x41   :  { %v272_v43 = vmax.f32 %v264_v61, 0.0  ;;  %v273_v16 = vmax.f32 %v265_v39, 0.0  ;;  %v274_v44 = vmax.f32 %v266_v41, 0.0  ;;  %v275_v40 = vmax.f32 %v267_v63, 0.0 }
  0x42   :  { %v276_v34 = vmax.f32 %v268_v10, 0.0  ;;  %v277_v51 = vmax.f32 %v269_v42, 0.0  ;;  %v278_v53 = vmax.f32 %v270_v14, 0.0  ;;  %v279_v36 = vmax.f32 %v271_v15, 0.0 }
  0x43   :  { %v281_v37 = vmul.f32 %v280_v35, %v272_v43  ;;  %v282_v54 = vmul.f32 %v280_v35, %v273_v16  ;;  %v283_v38 = vmul.f32 %v280_v35, %v274_v44  ;;  %v284_v23 = vmul.f32 %v280_v35, %v275_v40 }
  0x44   :  { %v285_v55 = vmul.f32 %v280_v35, %v276_v34  ;;  %v286_v60 = vmul.f32 %v280_v35, %v277_v51  ;;  %v287_v56 = vmul.f32 %v280_v35, %v278_v53  ;;  %v288_v52 = vmul.f32 %v280_v35, %v279_v36 }
  0x45   :  { %v1247_v57 = vadd.f32 %v281_v37, %v1195_v45  ;;  %v1250_v58 = vadd.f32 %v282_v54, %v1198_v46  ;;  %v1253_v59 = vadd.f32 %v283_v38, %v1201_v47  ;;  %v1256_v20 = vadd.f32 %v284_v23, %v1204_v48 }
  0x46   :  { %v1259_v21 = vadd.f32 %v285_v55, %v1207_v49  ;;  %v1262_v24 = vadd.f32 %v286_v60, %v1210_v50  ;;  %v1265_v35 = vadd.f32 %v287_v56, %v1213_v62  ;;  %v1268_v45 = vadd.f32 %v288_v52, %v1216_v33 }
  0x47   :  { %v301_v46 = vstv %s1238_s3  ;;  %v310_v25 = vstv %s1240_s4  ;;  %v327_v26 = vstv %s1242_s5  ;;  %v344_v47 = vstv %s1244_s6 }
  0x48   :  { %v302_v28 = vmul.f32 %v301_v46, %v997_v0  ;;  %v303_v48 = vmul.f32 %v301_v46, %v1002_v1  ;;  %v304_v49 = vmul.f32 %v301_v46, %v1007_v2  ;;  %v305_v29 = vmul.f32 %v301_v46, %v1012_v3 }
  0x49   :  { %v306_v50 = vmul.f32 %v301_v46, %v1017_v4  ;;  %v307_v62 = vmul.f32 %v301_v46, %v1022_v5  ;;  %v308_v30 = vmul.f32 %v301_v46, %v1027_v6  ;;  %v309_v33 = vmul.f32 %v301_v46, %v1032_v7 }
  0x4a   :  { %v311_v31 = vmul.f32 %v1037_v8, %v310_v25  ;;  %v312_v27 = vmul.f32 %v1042_v9, %v310_v25  ;;  %v313_v32 = vmul.f32 %v1047_v11, %v310_v25  ;;  %v314_v22 = vmul.f32 %v1052_v12, %v310_v25 }
  0x4b   :  { %v315_v61 = vmul.f32 %v1057_v13, %v310_v25  ;;  %v316_v39 = vmul.f32 %v1065_v17, %v310_v25  ;;  %v317_v41 = vmul.f32 %v1070_v18, %v310_v25  ;;  %v318_v63 = vmul.f32 %v1075_v19, %v310_v25 }
  0x4c   :  { %v319_v10 = vadd.f32 %v311_v31, %v302_v28  ;;  %v320_v42 = vadd.f32 %v312_v27, %v303_v48  ;;  %v321_v14 = vadd.f32 %v313_v32, %v304_v49  ;;  %v322_v15 = vadd.f32 %v314_v22, %v305_v29 }
  0x4d   :  { %v323_v43 = vadd.f32 %v315_v61, %v306_v50  ;;  %v324_v16 = vadd.f32 %v316_v39, %v307_v62  ;;  %v325_v44 = vadd.f32 %v317_v41, %v308_v30  ;;  %v326_v40 = vadd.f32 %v318_v63, %v309_v33 }
  0x4e   :  { %v328_v34 = vadd.f32 %v327_v26, %v319_v10  ;;  %v329_v51 = vadd.f32 %v327_v26, %v320_v42  ;;  %v330_v53 = vadd.f32 %v327_v26, %v321_v14  ;;  %v331_v36 = vadd.f32 %v327_v26, %v322_v15 }
  0x4f   :  { %v332_v37 = vadd.f32 %v327_v26, %v323_v43  ;;  %v333_v54 = vadd.f32 %v327_v26, %v324_v16  ;;  %v334_v38 = vadd.f32 %v327_v26, %v325_v44  ;;  %v335_v23 = vadd.f32 %v327_v26, %v326_v40 }
  0x50   :  { %v336_v55 = vmax.f32 %v328_v34, 0.0  ;;  %v337_v60 = vmax.f32 %v329_v51, 0.0  ;;  %v338_v56 = vmax.f32 %v330_v53, 0.0  ;;  %v339_v52 = vmax.f32 %v331_v36, 0.0 }
  0x51   :  { %v340_v46 = vmax.f32 %v332_v37, 0.0  ;;  %v341_v25 = vmax.f32 %v333_v54, 0.0  ;;  %v342_v28 = vmax.f32 %v334_v38, 0.0  ;;  %v343_v48 = vmax.f32 %v335_v23, 0.0 }
  0x52   :  { %v345_v49 = vmul.f32 %v344_v47, %v336_v55  ;;  %v346_v29 = vmul.f32 %v344_v47, %v337_v60  ;;  %v347_v50 = vmul.f32 %v344_v47, %v338_v56  ;;  %v348_v62 = vmul.f32 %v344_v47, %v339_v52 }
  0x53   :  { %v349_v30 = vmul.f32 %v344_v47, %v340_v46  ;;  %v350_v33 = vmul.f32 %v344_v47, %v341_v25  ;;  %v351_v31 = vmul.f32 %v344_v47, %v342_v28  ;;  %v352_v26 = vmul.f32 %v344_v47, %v343_v48 }
  0x54   :  { %v1299_v27 = vadd.f32 %v345_v49, %v1247_v57  ;;  %v1302_v32 = vadd.f32 %v346_v29, %v1250_v58  ;;  %v1305_v22 = vadd.f32 %v347_v50, %v1253_v59  ;;  %v1308_v61 = vadd.f32 %v348_v62, %v1256_v20 }
  0x55   :  { %v1311_v39 = vadd.f32 %v349_v30, %v1259_v21  ;;  %v1314_v41 = vadd.f32 %v350_v33, %v1262_v24  ;;  %v1317_v47 = vadd.f32 %v351_v31, %v1265_v35  ;;  %v1320_v57 = vadd.f32 %v352_v26, %v1268_v45 }
  0x56   :  { %v365_v58 = vstv %s1290_s7  ;;  %v374_v63 = vstv %s1292_s8  ;;  %v391_v10 = vstv %s1294_s9  ;;  %v408_v59 = vstv %s1296_s10 }
  0x57   :  { %v366_v42 = vmul.f32 %v365_v58, %v997_v0  ;;  %v367_v20 = vmul.f32 %v365_v58, %v1002_v1  ;;  %v368_v21 = vmul.f32 %v365_v58, %v1007_v2  ;;  %v369_v14 = vmul.f32 %v365_v58, %v1012_v3 }
  0x58   :  { %v370_v24 = vmul.f32 %v365_v58, %v1017_v4  ;;  %v371_v35 = vmul.f32 %v365_v58, %v1022_v5  ;;  %v372_v15 = vmul.f32 %v365_v58, %v1027_v6  ;;  %v373_v45 = vmul.f32 %v365_v58, %v1032_v7 }
  0x59   :  { %v375_v43 = vmul.f32 %v1037_v8, %v374_v63  ;;  %v376_v16 = vmul.f32 %v1042_v9, %v374_v63  ;;  %v377_v44 = vmul.f32 %v1047_v11, %v374_v63  ;;  %v378_v40 = vmul.f32 %v1052_v12, %v374_v63 }
  0x5a   :  { %v379_v34 = vmul.f32 %v1057_v13, %v374_v63  ;;  %v380_v51 = vmul.f32 %v1065_v17, %v374_v63  ;;  %v381_v53 = vmul.f32 %v1070_v18, %v374_v63  ;;  %v382_v36 = vmul.f32 %v1075_v19, %v374_v63 }
  0x5b   :  { %v383_v37 = vadd.f32 %v375_v43, %v366_v42  ;;  %v384_v54 = vadd.f32 %v376_v16, %v367_v20  ;;  %v385_v38 = vadd.f32 %v377_v44, %v368_v21  ;;  %v386_v23 = vadd.f32 %v378_v40, %v369_v14 }
  0x5c   :  { %v387_v55 = vadd.f32 %v379_v34, %v370_v24  ;;  %v388_v60 = vadd.f32 %v380_v51, %v371_v35  ;;  %v389_v56 = vadd.f32 %v381_v53, %v372_v15  ;;  %v390_v52 = vadd.f32 %v382_v36, %v373_v45 }
  0x5d   :  { %v392_v46 = vadd.f32 %v391_v10, %v383_v37  ;;  %v393_v25 = vadd.f32 %v391_v10, %v384_v54  ;;  %v394_v28 = vadd.f32 %v391_v10, %v385_v38  ;;  %v395_v48 = vadd.f32 %v391_v10, %v386_v23 }
  0x5e   :  { %v396_v49 = vadd.f32 %v391_v10, %v387_v55  ;;  %v397_v29 = vadd.f32 %v391_v10, %v388_v60  ;;  %v398_v50 = vadd.f32 %v391_v10, %v389_v56  ;;  %v399_v62 = vadd.f32 %v391_v10, %v390_v52 }
  0x5f   :  { %v400_v30 = vmax.f32 %v392_v46, 0.0  ;;  %v401_v33 = vmax.f32 %v393_v25, 0.0  ;;  %v402_v31 = vmax.f32 %v394_v28, 0.0  ;;  %v403_v26 = vmax.f32 %v395_v48, 0.0 }
  0x60   :  { %v404_v58 = vmax.f32 %v396_v49, 0.0  ;;  %v405_v63 = vmax.f32 %v397_v29, 0.0  ;;  %v406_v42 = vmax.f32 %v398_v50, 0.0  ;;  %v407_v20 = vmax.f32 %v399_v62, 0.0 }
  0x61   :  { %v409_v21 = vmul.f32 %v408_v59, %v400_v30  ;;  %v410_v14 = vmul.f32 %v408_v59, %v401_v33  ;;  %v411_v24 = vmul.f32 %v408_v59, %v402_v31  ;;  %v412_v35 = vmul.f32 %v408_v59, %v403_v26 }
  0x62   :  { %v413_v15 = vmul.f32 %v408_v59, %v404_v58  ;;  %v414_v45 = vmul.f32 %v408_v59, %v405_v63  ;;  %v415_v43 = vmul.f32 %v408_v59, %v406_v42  ;;  %v416_v10 = vmul.f32 %v408_v59, %v407_v20 }
  0x63   :  { %v1351_v16 = vadd.f32 %v409_v21, %v1299_v27  ;;  %v1354_v44 = vadd.f32 %v410_v14, %v1302_v32  ;;  %v1357_v40 = vadd.f32 %v411_v24, %v1305_v22  ;;  %v1360_v34 = vadd.f32 %v412_v35, %v1308_v61 }
  0x64   :  { %v1363_v51 = vadd.f32 %v413_v15, %v1311_v39  ;;  %v1366_v53 = vadd.f32 %v414_v45, %v1314_v41  ;;  %v1369_v59 = vadd.f32 %v415_v43, %v1317_v47  ;;  %v1372_v27 = vadd.f32 %v416_v10, %v1320_v57 }
  0x65   :  { %v429_v32 = vstv %s1342_s11  ;;  %v438_v36 = vstv %s1344_s12  ;;  %v455_v37 = vstv %s1346_s16  ;;  %v472_v22 = vstv %s1348_s13 }
  0x66   :  { %v430_v54 = vmul.f32 %v429_v32, %v997_v0  ;;  %v431_v61 = vmul.f32 %v429_v32, %v1002_v1  ;;  %v432_v39 = vmul.f32 %v429_v32, %v1007_v2  ;;  %v433_v38 = vmul.f32 %v429_v32, %v1012_v3 }
  0x67   :  { %v434_v41 = vmul.f32 %v429_v32, %v1017_v4  ;;  %v435_v47 = vmul.f32 %v429_v32, %v1022_v5  ;;  %v436_v23 = vmul.f32 %v429_v32, %v1027_v6  ;;  %v437_v57 = vmul.f32 %v429_v32, %v1032_v7 }
  0x68   :  { %v439_v55 = vmul.f32 %v1037_v8, %v438_v36  ;;  %v440_v60 = vmul.f32 %v1042_v9, %v438_v36  ;;  %v441_v56 = vmul.f32 %v1047_v11, %v438_v36  ;;  %v442_v52 = vmul.f32 %v1052_v12, %v438_v36 }
  0x69   :  { %v443_v46 = vmul.f32 %v1057_v13, %v438_v36  ;;  %v444_v25 = vmul.f32 %v1065_v17, %v438_v36  ;;  %v445_v28 = vmul.f32 %v1070_v18, %v438_v36  ;;  %v446_v48 = vmul.f32 %v1075_v19, %v438_v36 }
  0x6a   :  { %v447_v49 = vadd.f32 %v439_v55, %v430_v54  ;;  %v448_v29 = vadd.f32 %v440_v60, %v431_v61  ;;  %v449_v50 = vadd.f32 %v441_v56, %v432_v39  ;;  %v450_v62 = vadd.f32 %v442_v52, %v433_v38 }
  0x6b   :  { %v451_v30 = vadd.f32 %v443_v46, %v434_v41  ;;  %v452_v33 = vadd.f32 %v444_v25, %v435_v47  ;;  %v453_v31 = vadd.f32 %v445_v28, %v436_v23  ;;  %v454_v26 = vadd.f32 %v446_v48, %v437_v57 }
  0x6c   :  { %v456_v58 = vadd.f32 %v455_v37, %v447_v49  ;;  %v457_v63 = vadd.f32 %v455_v37, %v448_v29  ;;  %v458_v42 = vadd.f32 %v455_v37, %v449_v50  ;;  %v459_v20 = vadd.f32 %v455_v37, %v450_v62 }
  0x6d   :  { %v460_v21 = vadd.f32 %v455_v37, %v451_v30  ;;  %v461_v14 = vadd.f32 %v455_v37, %v452_v33  ;;  %v462_v24 = vadd.f32 %v455_v37, %v453_v31  ;;  %v463_v35 = vadd.f32 %v455_v37, %v454_v26 }
  0x6e   :  { %v464_v15 = vmax.f32 %v456_v58, 0.0  ;;  %v465_v45 = vmax.f32 %v457_v63, 0.0  ;;  %v466_v43 = vmax.f32 %v458_v42, 0.0  ;;  %v467_v10 = vmax.f32 %v459_v20, 0.0 }
  0x6f   :  { %v468_v32 = vmax.f32 %v460_v21, 0.0  ;;  %v469_v36 = vmax.f32 %v461_v14, 0.0  ;;  %v470_v54 = vmax.f32 %v462_v24, 0.0  ;;  %v471_v61 = vmax.f32 %v463_v35, 0.0 }
  0x70   :  { %v473_v39 = vmul.f32 %v472_v22, %v464_v15  ;;  %v474_v38 = vmul.f32 %v472_v22, %v465_v45  ;;  %v475_v41 = vmul.f32 %v472_v22, %v466_v43  ;;  %v476_v47 = vmul.f32 %v472_v22, %v467_v10 }
  0x71   :  { %v477_v23 = vmul.f32 %v472_v22, %v468_v32  ;;  %v478_v57 = vmul.f32 %v472_v22, %v469_v36  ;;  %v479_v55 = vmul.f32 %v472_v22, %v470_v54  ;;  %v480_v37 = vmul.f32 %v472_v22, %v471_v61 }
  0x72   :  { %v1403_v60 = vadd.f32 %v473_v39, %v1351_v16  ;;  %v1406_v56 = vadd.f32 %v474_v38, %v1354_v44  ;;  %v1409_v52 = vadd.f32 %v475_v41, %v1357_v40  ;;  %v1412_v46 = vadd.f32 %v476_v47, %v1360_v34 }
  0x73   :  { %v1415_v25 = vadd.f32 %v477_v23, %v1363_v51  ;;  %v1418_v28 = vadd.f32 %v478_v57, %v1366_v53  ;;  %v1421_v22 = vadd.f32 %v479_v55, %v1369_v59  ;;  %v1424_v16 = vadd.f32 %v480_v37, %v1372_v27 }
  0x74   :  { %v493_v44 = vstv %s1394_s17  ;;  %v502_v48 = vstv %s1396_s19  ;;  %v519_v49 = vstv %s1398_s20  ;;  %v536_v40 = vstv %s1400_s0 }
  0x75   :  { %v494_v29 = vmul.f32 %v493_v44, %v997_v0  ;;  %v495_v34 = vmul.f32 %v493_v44, %v1002_v1  ;;  %v496_v51 = vmul.f32 %v493_v44, %v1007_v2  ;;  %v497_v50 = vmul.f32 %v493_v44, %v1012_v3 }
  0x76   :  { %v498_v53 = vmul.f32 %v493_v44, %v1017_v4  ;;  %v499_v59 = vmul.f32 %v493_v44, %v1022_v5  ;;  %v500_v62 = vmul.f32 %v493_v44, %v1027_v6  ;;  %v501_v27 = vmul.f32 %v493_v44, %v1032_v7 }
  0x77   :  { %v503_v30 = vmul.f32 %v1037_v8, %v502_v48  ;;  %v504_v33 = vmul.f32 %v1042_v9, %v502_v48  ;;  %v505_v0 = vmul.f32 %v1047_v11, %v502_v48  ;;  %v506_v1 = vmul.f32 %v1052_v12, %v502_v48 }
  0x78   :  { %v507_v2 = vmul.f32 %v1057_v13, %v502_v48  ;;  %v508_v3 = vmul.f32 %v1065_v17, %v502_v48  ;;  %v509_v4 = vmul.f32 %v1070_v18, %v502_v48  ;;  %v510_v5 = vmul.f32 %v1075_v19, %v502_v48 }
  0x79   :  { %v511_v6 = vadd.f32 %v503_v30, %v494_v29  ;;  %v512_v7 = vadd.f32 %v504_v33, %v495_v34  ;;  %v513_v31 = vadd.f32 %v505_v0, %v496_v51  ;;  %v514_v8 = vadd.f32 %v506_v1, %v497_v50  ;;  %v1505_v51 = vld [vmem:[%s1763_s1 + $0x18] sm:$0xff]  ;;  %v1523_v30 = vld [vmem:[%s1763_s1 + $0x30] sm:$0xff] }
  0x7a   :  { %v515_v9 = vadd.f32 %v507_v2, %v498_v53  ;;  %v516_v11 = vadd.f32 %v508_v3, %v499_v59  ;;  %v517_v26 = vadd.f32 %v509_v4, %v500_v62  ;;  %v518_v12 = vadd.f32 %v510_v5, %v501_v27  ;;  %v1511_v53 = vld [vmem:[%s1763_s1 + $0x20] sm:$0xff]  ;;  %v1517_v62 = vld [vmem:[%s1763_s1 + $0x28] sm:$0xff]  ;;  %v1529_v0 = vld [vmem:[%s1763_s1 + $0x38] sm:$0xff] }
  0x7b   :  { %v520_v13 = vadd.f32 %v519_v49, %v511_v6  ;;  %v521_v17 = vadd.f32 %v519_v49, %v512_v7  ;;  %v522_v58 = vadd.f32 %v519_v49, %v513_v31  ;;  %v523_v18 = vadd.f32 %v519_v49, %v514_v8  ;;  %v1535_v2 = vld [vmem:[%s1763_s1 + $0x40] sm:$0xff]  ;;  %v1541_v4 = vld [vmem:[%s1763_s1 + $0x48] sm:$0xff]  ;;  %v1547_v6 = vld [vmem:[%s1763_s1 + $0x50] sm:$0xff] }
  0x7c   :  { %v524_v19 = vadd.f32 %v519_v49, %v515_v9  ;;  %v525_v63 = vadd.f32 %v519_v49, %v516_v11  ;;  %v526_v42 = vadd.f32 %v519_v49, %v517_v26  ;;  %v527_v20 = vadd.f32 %v519_v49, %v518_v12  ;;  %v1553_v31 = vld [vmem:[%s1763_s1 + $0x58] sm:$0xff]  ;;  %v1559_v9 = vld [vmem:[%s1763_s1 + $0x60] sm:$0xff]  ;;  %v1565_v26 = vld [vmem:[%s1763_s1 + $0x68] sm:$0xff] }
  0x7d   :  { %v528_v21 = vmax.f32 %v520_v13, 0.0  ;;  %v529_v14 = vmax.f32 %v521_v17, 0.0  ;;  %v530_v24 = vmax.f32 %v522_v58, 0.0  ;;  %v531_v35 = vmax.f32 %v523_v18, 0.0  ;;  %v1571_v13 = vld [vmem:[%s1763_s1 + $0x70] sm:$0xff]  ;;  %v1577_v58 = vld [vmem:[%s1763_s1 + $0x78] sm:$0xff] }
  0x7e   :  { %v532_v15 = vmax.f32 %v524_v19, 0.0  ;;  %v533_v45 = vmax.f32 %v525_v63, 0.0  ;;  %v534_v43 = vmax.f32 %v526_v42, 0.0  ;;  %v535_v10 = vmax.f32 %v527_v20, 0.0 }
  0x7f   :  { %v537_v32 = vmul.f32 %v536_v40, %v528_v21  ;;  %v538_v36 = vmul.f32 %v536_v40, %v529_v14  ;;  %v539_v54 = vmul.f32 %v536_v40, %v530_v24  ;;  %v540_v61 = vmul.f32 %v536_v40, %v531_v35 }
  0x80   :  { %v541_v39 = vmul.f32 %v536_v40, %v532_v15  ;;  %v542_v38 = vmul.f32 %v536_v40, %v533_v45  ;;  %v543_v41 = vmul.f32 %v536_v40, %v534_v43  ;;  %v544_v47 = vmul.f32 %v536_v40, %v535_v10 }
  0x81   :  { %v1455_v23 = vadd.f32 %v537_v32, %v1403_v60  ;;  %v1458_v57 = vadd.f32 %v538_v36, %v1406_v56  ;;  %v1461_v55 = vadd.f32 %v539_v54, %v1409_v52  ;;  %v1464_v37 = vadd.f32 %v540_v61, %v1412_v46  ;;  %v1487_v46 = vld [vmem:[%s1763_s1] sm:$0xff] }
  0x82   :  { %v1467_v44 = vadd.f32 %v541_v39, %v1415_v25  ;;  %v1470_v48 = vadd.f32 %v542_v38, %v1418_v28  ;;  %v1473_v49 = vadd.f32 %v543_v41, %v1421_v22  ;;  %v1476_v60 = vadd.f32 %v544_v47, %v1424_v16  ;;  %v1493_v28 = vld [vmem:[%s1763_s1 + $0x8] sm:$0xff]  ;;  %v1499_v16 = vld [vmem:[%s1763_s1 + $0x10] sm:$0xff]  ;;  %s1586_s1 = sld [smem:[#allocation2 + $0x27]] }
  0x83   :  { %v557_v56 = vstv %s1446_s21  ;;  %v566_v40 = vstv %s1448_s22  ;;  %v583_v29 = vstv %s1450_s23  ;;  %v1482_v52 = vstv %s1452_s14 }
  0x84   :  { %v558_v25 = vmul.f32 %v1487_v46, %v557_v56  ;;  %v559_v22 = vmul.f32 %v1493_v28, %v557_v56  ;;  %v560_v34 = vmul.f32 %v1499_v16, %v557_v56  ;;  %v561_v50 = vmul.f32 %v1505_v51, %v557_v56 }
  0x85   :  { %v562_v59 = vmul.f32 %v1511_v53, %v557_v56  ;;  %v563_v27 = vmul.f32 %v1517_v62, %v557_v56  ;;  %v564_v33 = vmul.f32 %v1523_v30, %v557_v56  ;;  %v565_v1 = vmul.f32 %v1529_v0, %v557_v56 }
  0x86   :  { %v567_v3 = vmul.f32 %v1535_v2, %v566_v40  ;;  %v568_v5 = vmul.f32 %v1541_v4, %v566_v40  ;;  %v569_v7 = vmul.f32 %v1547_v6, %v566_v40  ;;  %v570_v8 = vmul.f32 %v1553_v31, %v566_v40 }
  0x87   :  { %v571_v11 = vmul.f32 %v1559_v9, %v566_v40  ;;  %v572_v12 = vmul.f32 %v1565_v26, %v566_v40  ;;  %v573_v17 = vmul.f32 %v1571_v13, %v566_v40  ;;  %v574_v18 = vmul.f32 %v1577_v58, %v566_v40 }
  0x88   :  { %v575_v19 = vadd.f32 %v567_v3, %v558_v25  ;;  %v576_v63 = vadd.f32 %v568_v5, %v559_v22  ;;  %v577_v42 = vadd.f32 %v569_v7, %v560_v34  ;;  %v578_v20 = vadd.f32 %v570_v8, %v561_v50 }
  0x89   :  { %v579_v21 = vadd.f32 %v571_v11, %v562_v59  ;;  %v580_v14 = vadd.f32 %v572_v12, %v563_v27  ;;  %v581_v24 = vadd.f32 %v573_v17, %v564_v33  ;;  %v582_v35 = vadd.f32 %v574_v18, %v565_v1 }
  0x8a   :  { %v584_v15 = vadd.f32 %v583_v29, %v575_v19  ;;  %v585_v45 = vadd.f32 %v583_v29, %v576_v63  ;;  %v586_v43 = vadd.f32 %v583_v29, %v577_v42  ;;  %v587_v10 = vadd.f32 %v583_v29, %v578_v20 }
  0x8b   :  { %v588_v32 = vadd.f32 %v583_v29, %v579_v21  ;;  %v589_v36 = vadd.f32 %v583_v29, %v580_v14  ;;  %v590_v54 = vadd.f32 %v583_v29, %v581_v24  ;;  %v591_v61 = vadd.f32 %v583_v29, %v582_v35 }
  0x8c   :  { %v592_v39 = vmax.f32 %v584_v15, 0.0  ;;  %v593_v38 = vmax.f32 %v585_v45, 0.0  ;;  %v594_v41 = vmax.f32 %v586_v43, 0.0  ;;  %v595_v47 = vmax.f32 %v587_v10, 0.0 }
  0x8d   :  { %v596_v56 = vmax.f32 %v588_v32, 0.0  ;;  %v597_v40 = vmax.f32 %v589_v36, 0.0  ;;  %v598_v25 = vmax.f32 %v590_v54, 0.0  ;;  %v599_v22 = vmax.f32 %v591_v61, 0.0 }
  0x8e   :  { %v601_v34 = vmul.f32 %v1482_v52, %v592_v39  ;;  %v602_v50 = vmul.f32 %v1482_v52, %v593_v38  ;;  %v603_v59 = vmul.f32 %v1482_v52, %v594_v41  ;;  %v604_v27 = vmul.f32 %v1482_v52, %v595_v47 }
  0x8f   :  { %v605_v29 = vmul.f32 %v1482_v52, %v596_v56  ;;  %v606_v33 = vmul.f32 %v1482_v52, %v597_v40  ;;  %v607_v1 = vmul.f32 %v1482_v52, %v598_v25  ;;  %v608_v3 = vmul.f32 %v1482_v52, %v599_v22 }
  0x90   :  { %v609_v5 = vadd.f32 %v601_v34, %v1455_v23  ;;  %v610_v7 = vadd.f32 %v602_v50, %v1458_v57  ;;  %v611_v8 = vadd.f32 %v603_v59, %v1461_v55  ;;  %v612_v11 = vadd.f32 %v604_v27, %v1464_v37 }
  0x91   :  { %v613_v12 = vadd.f32 %v605_v29, %v1467_v44  ;;  %v614_v17 = vadd.f32 %v606_v33, %v1470_v48  ;;  %v615_v18 = vadd.f32 %v607_v1, %v1473_v49  ;;  %v616_v19 = vadd.f32 %v608_v3, %v1476_v60 }
  0x92   :  { %v621_v63 = vstv %s1580_s25  ;;  %v630_v42 = vstv %s1582_s26  ;;  %v647_v20 = vstv %s1584_s27  ;;  %v664_v52 = vstv %s1586_s1 }
  0x93   :  { %v622_v23 = vmul.f32 %v1487_v46, %v621_v63  ;;  %v623_v57 = vmul.f32 %v1493_v28, %v621_v63  ;;  %v624_v55 = vmul.f32 %v1499_v16, %v621_v63  ;;  %v625_v37 = vmul.f32 %v1505_v51, %v621_v63 }
  0x94   :  { %v626_v44 = vmul.f32 %v1511_v53, %v621_v63  ;;  %v627_v48 = vmul.f32 %v1517_v62, %v621_v63  ;;  %v628_v49 = vmul.f32 %v1523_v30, %v621_v63  ;;  %v629_v60 = vmul.f32 %v1529_v0, %v621_v63 }
  0x95   :  { %v631_v21 = vmul.f32 %v1535_v2, %v630_v42  ;;  %v632_v14 = vmul.f32 %v1541_v4, %v630_v42  ;;  %v633_v46 = vmul.f32 %v1547_v6, %v630_v42  ;;  %v634_v28 = vmul.f32 %v1553_v31, %v630_v42 }
  0x96   :  { %v635_v16 = vmul.f32 %v1559_v9, %v630_v42  ;;  %v636_v51 = vmul.f32 %v1565_v26, %v630_v42  ;;  %v637_v53 = vmul.f32 %v1571_v13, %v630_v42  ;;  %v638_v62 = vmul.f32 %v1577_v58, %v630_v42 }
  0x97   :  { %v639_v24 = vadd.f32 %v631_v21, %v622_v23  ;;  %v640_v30 = vadd.f32 %v632_v14, %v623_v57  ;;  %v641_v35 = vadd.f32 %v633_v46, %v624_v55  ;;  %v642_v0 = vadd.f32 %v634_v28, %v625_v37 }
  0x98   :  { %v643_v15 = vadd.f32 %v635_v16, %v626_v44  ;;  %v644_v2 = vadd.f32 %v636_v51, %v627_v48  ;;  %v645_v45 = vadd.f32 %v637_v53, %v628_v49  ;;  %v646_v4 = vadd.f32 %v638_v62, %v629_v60 }
  0x99   :  { %v648_v43 = vadd.f32 %v647_v20, %v639_v24  ;;  %v649_v6 = vadd.f32 %v647_v20, %v640_v30  ;;  %v650_v10 = vadd.f32 %v647_v20, %v641_v35  ;;  %v651_v31 = vadd.f32 %v647_v20, %v642_v0 }
  0x9a   :  { %v652_v9 = vadd.f32 %v647_v20, %v643_v15  ;;  %v653_v32 = vadd.f32 %v647_v20, %v644_v2  ;;  %v654_v26 = vadd.f32 %v647_v20, %v645_v45  ;;  %v655_v36 = vadd.f32 %v647_v20, %v646_v4 }
  0x9b   :  { %v656_v13 = vmax.f32 %v648_v43, 0.0  ;;  %v657_v54 = vmax.f32 %v649_v6, 0.0  ;;  %v658_v58 = vmax.f32 %v650_v10, 0.0  ;;  %v659_v61 = vmax.f32 %v651_v31, 0.0 }
  0x9c   :  { %v660_v39 = vmax.f32 %v652_v9, 0.0  ;;  %v661_v38 = vmax.f32 %v653_v32, 0.0  ;;  %v662_v41 = vmax.f32 %v654_v26, 0.0  ;;  %v663_v47 = vmax.f32 %v655_v36, 0.0 }
  0x9d   :  { %v665_v56 = vmul.f32 %v664_v52, %v656_v13  ;;  %v666_v40 = vmul.f32 %v664_v52, %v657_v54  ;;  %v667_v25 = vmul.f32 %v664_v52, %v658_v58  ;;  %v668_v22 = vmul.f32 %v664_v52, %v659_v61 }
  0x9e   :  { %v669_v34 = vmul.f32 %v664_v52, %v660_v39  ;;  %v670_v50 = vmul.f32 %v664_v52, %v661_v38  ;;  %v671_v59 = vmul.f32 %v664_v52, %v662_v41  ;;  %v672_v27 = vmul.f32 %v664_v52, %v663_v47 }
  0x9f   :  { %v673_v29 = vadd.f32 %v665_v56, %v609_v5  ;;  %v674_v33 = vadd.f32 %v666_v40, %v610_v7  ;;  %v675_v1 = vadd.f32 %v667_v25, %v611_v8  ;;  %v676_v3 = vadd.f32 %v668_v22, %v612_v11 }
  0xa0   :  { %v677_v63 = vadd.f32 %v669_v34, %v613_v12  ;;  %v678_v42 = vadd.f32 %v670_v50, %v614_v17  ;;  %v679_v20 = vadd.f32 %v671_v59, %v615_v18  ;;  %v680_v23 = vadd.f32 %v672_v27, %v616_v19 }
  0xa1   :  { %v682_v57 = vstv %s903_s28 }
  0xa2   :  { %v683_v55 = vadd.f32 %v682_v57, %v673_v29  ;;  %v684_v37 = vadd.f32 %v682_v57, %v674_v33  ;;  %v685_v44 = vadd.f32 %v682_v57, %v675_v1  ;;  %v686_v48 = vadd.f32 %v682_v57, %v676_v3 }
  0xa3   :  { %v687_v49 = vadd.f32 %v682_v57, %v677_v63  ;;  %v688_v60 = vadd.f32 %v682_v57, %v678_v42  ;;  %v689_v21 = vadd.f32 %v682_v57, %v679_v20  ;;  %v690_v52 = vadd.f32 %v682_v57, %v680_v23 }
  0xa4   :  { %v904_v14 = vmul.f32 -1.442695, %v683_v55  ;;  %v905_v46 = vmul.f32 -1.442695, %v684_v37  ;;  %v906_v28 = vmul.f32 -1.442695, %v685_v44 }
  0xa5   :  { %v907_v5 = vmul.f32 -1.442695, %v686_v48  ;;  %v908_v7 = vmul.f32 -1.442695, %v687_v49  ;;  %v909_v8 = vmul.f32 -1.442695, %v688_v60 }
  0xa6   :  { %913 = vpow2.f32 %v904_v14  ;;  %v910_v11 = vmul.f32 -1.442695, %v689_v21  ;;  %v911_v12 = vmul.f32 -1.442695, %v690_v52 }
  0xa7   :  { %915 = vpow2.f32 %v905_v46 }
  0xa8   :  { %917 = vpow2.f32 %v906_v28 }
  0xa9   :  { %919 = vpow2.f32 %v907_v5 }
  0xaa   :  { %921 = vpow2.f32 %v908_v7 }
  0xab   :  { %923 = vpow2.f32 %v909_v8 }
  0xac   :  { %v914_v17 = vpop.eup %913  ;;  %925 = vpow2.f32 %v910_v11 }
  0xad   :  { %v916_v18 = vpop.eup %915  ;;  %927 = vpow2.f32 %v911_v12  ;;  %v715_v19 = vadd.f32 1.0, %v914_v17 }
  0xae   :  { %v918_v16 = vpop.eup %917  ;;  %v716_v51 = vadd.f32 1.0, %v916_v18 }
  0xaf   :  { %v920_v53 = vpop.eup %919  ;;  %v1624_v62 = vadd.f32 1.0, %v918_v16  ;;  %929 = vrcp.f32 %v715_v19  ;;  %v732_v35 = vand.u32 2147483647, %v715_v19  ;;  %v734_v0 = vand.u32 2147483648, %v715_v19 }
  0xb0   :  { %v922_v24 = vpop.eup %921  ;;  %v1626_v30 = vadd.f32 1.0, %v920_v53  ;;  %931 = vrcp.f32 %v716_v51  ;;  %v747_v45 = vand.u32 2147483647, %v716_v51  ;;  %v749_v4 = vand.u32 2147483648, %v716_v51 }
  0xb1   :  { %v924_v15 = vpop.eup %923  ;;  %v1628_v2 = vadd.f32 1.0, %v922_v24  ;;  %933 = vrcp.f32 %v1624_v62  ;;  %vm728_vm0 = vweird.f32 %v715_v19  ;;  %vm743_vm1 = vweird.f32 %v716_v51 }
  0xb2   :  { %v926_v43 = vpop.eup %925  ;;  %v1631_v10 = vadd.f32 1.0, %v924_v15  ;;  %v762_v31 = vand.u32 2147483647, %v1624_v62  ;;  %vm1634_vm2 = vcmp.eq.f32.partialorder %v732_v35, 8.507059e+37  ;;  %v735_v32 = vor.u32 1.1754944e-38, %v734_v0 }
  0xb3   :  { %v928_v6 = vpop.eup %927  ;;  %vm758_vm3 = vweird.f32 %v1624_v62  ;;  %v764_v26 = vand.u32 2147483648, %v1624_v62  ;;  %935 = vrcp.f32 %v1626_v30  ;;  %v1641_v13 = vadd.f32 1.0, %v926_v43 }
  0xb4   :  { %vm1643_vm4 = vcmp.eq.f32.partialorder %v747_v45, 8.507059e+37  ;;  %v750_v58 = vor.u32 1.1754944e-38, %v749_v4  ;;  %937 = vrcp.f32 %v1628_v2  ;;  %v1648_v39 = vadd.f32 1.0, %v928_v6 }
  0xb5   :  { %v930_v36 = vpop.eup %929  ;;  %v777_v41 = vand.u32 2147483647, %v1626_v30  ;;  %v779_v47 = vand.u32 2147483648, %v1626_v30  ;;  %vm1652_vm6 = vcmp.eq.f32.partialorder %v762_v31, 8.507059e+37  ;;  %vm773_vm7 = vweird.f32 %v1626_v30 }
  0xb6   :  { %v932_v61 = vpop.eup %931  ;;  %v724_v38 = vmul.f32 %v930_v36, %v715_v19  ;;  %vm729_vm5 = vweird.f32 %v930_v36  ;;  %v765_v34 = vor.u32 1.1754944e-38, %v764_v26  ;;  %v792_v50 = vand.u32 2147483647, %v1628_v2 }
  0xb7   :  { %v739_v56 = vmul.f32 %v932_v61, %v716_v51  ;;  %v934_v25 = vpop.eup %933  ;;  %939 = vrcp.f32 %v1631_v10  ;;  %vm744_vm8 = vweird.f32 %v932_v61  ;;  %vm788_vm9 = vweird.f32 %v1628_v2  ;;  %vm1668_vm11 = vmor %vm728_vm0, %vm729_vm5 }
  0xb8   :  { %v725_v22 = vsub.f32 1.0, %v724_v38  ;;  %v754_v27 = vmul.f32 %v934_v25, %v1624_v62  ;;  %vm1661_vm10 = vcmp.eq.f32.partialorder %v777_v41, 8.507059e+37  ;;  %v780_v3 = vor.u32 1.1754944e-38, %v779_v47  ;;  %vm1675_vm13 = vmor %vm743_vm1, %vm744_vm8 }
  0xb9   :  { %v740_v59 = vsub.f32 1.0, %v739_v56  ;;  %v936_v29 = vpop.eup %935  ;;  %v794_v63 = vand.u32 2147483648, %v1628_v2  ;;  %vm759_vm12 = vweird.f32 %v934_v25  ;;  %vm1680_vm14 = vcmp.eq.f32.partialorder %v792_v50, 8.507059e+37 }
  0xba   :  { %v726_v33 = vmul.f32 %v930_v36, %v725_v22  ;;  %v938_v42 = vpop.eup %937  ;;  %v755_v57 = vsub.f32 1.0, %v754_v27  ;;  %v769_v55 = vmul.f32 %v936_v29, %v1626_v30  ;;  %vm803_vm15 = vweird.f32 %v1631_v10  ;;  %vm1689_vm1 = vmor %vm758_vm3, %vm759_vm12 }
  0xbb   :  { %v741_v23 = vmul.f32 %v932_v61, %v740_v59  ;;  %v784_v48 = vmul.f32 %v938_v42, %v1628_v2  ;;  %vm774_vm0 = vweird.f32 %v936_v29  ;;  %vm789_vm5 = vweird.f32 %v938_v42 }
  0xbc   :  { %v727_v37 = vadd.f32 %v930_v36, %v726_v33  ;;  %v756_v21 = vmul.f32 %v934_v25, %v755_v57  ;;  %v770_v14 = vsub.f32 1.0, %v769_v55  ;;  %941 = vrcp.f32 %v1641_v13  ;;  %vm1702_vm3 = vmor %vm773_vm7, %vm774_vm0 }
  0xbd   :  { %v742_v60 = vadd.f32 %v932_v61, %v741_v23  ;;  %v940_v46 = vpop.eup %939  ;;  %v785_v5 = vsub.f32 1.0, %v784_v48  ;;  %v795_v16 = vor.u32 1.1754944e-38, %v794_v63  ;;  %v807_v30 = vand.u32 2147483647, %v1631_v10 }
  0xbe   :  { %v731_v28 = vsel %vm1668_vm11, %v930_v36, %v727_v37  ;;  %v757_v11 = vadd.f32 %v934_v25, %v756_v21  ;;  %v771_v12 = vmul.f32 %v936_v29, %v770_v14  ;;  %v799_v51 = vmul.f32 %v940_v46, %v1631_v10 }
  0xbf   :  { %v736_v7 = vsel %vm1634_vm2, %v735_v32, %v731_v28  ;;  %v746_v8 = vsel %vm1675_vm13, %v932_v61, %v742_v60  ;;  %v786_v19 = vmul.f32 %v938_v42, %v785_v5  ;;  %vm1714_vm2 = vmor %vm788_vm9, %vm789_vm5  ;;  %v809_v35 = vand.u32 2147483648, %v1631_v10 }
  0xc0   :  { %v751_v17 = vsel %vm1643_vm4, %v750_v58, %v746_v8  ;;  %843 = vst [vmem:[%s1764_s2] sm:$0xff] %v736_v7  ;;  %v761_v53 = vsel %vm1689_vm1, %v934_v25, %v757_v11  ;;  %v772_v62 = vadd.f32 %v936_v29, %v771_v12  ;;  %v800_v45 = vsub.f32 1.0, %v799_v51 }
  0xc1   :  { %844 = vst [vmem:[%s1764_s2 + $0x8] sm:$0xff] %v751_v17  ;;  %v766_v0 = vsel %vm1652_vm6, %v765_v34, %v761_v53  ;;  %v787_v15 = vadd.f32 %v938_v42, %v786_v19  ;;  %vm804_vm4 = vweird.f32 %v940_v46  ;;  %943 = vrcp.f32 %v1648_v39 }
  0xc2   :  { %v776_v2 = vsel %vm1702_vm3, %v936_v29, %v772_v62  ;;  %845 = vst [vmem:[%s1764_s2 + $0x10] sm:$0xff] %v766_v0  ;;  %v942_v4 = vpop.eup %941  ;;  %v801_v31 = vmul.f32 %v940_v46, %v800_v45  ;;  %vm805_vm6 = vmor %vm803_vm15, %vm804_vm4  ;;  %v810_v32 = vor.u32 1.1754944e-38, %v809_v35  ;;  %vm808_vm7 = vcmp.eq.f32.partialorder %v807_v30, 8.507059e+37 }
  0xc3   :  { %v781_v43 = vsel %vm1661_vm10, %v780_v3, %v776_v2  ;;  %v791_v6 = vsel %vm1714_vm2, %v938_v42, %v787_v15  ;;  %v814_v26 = vmul.f32 %v942_v4, %v1641_v13  ;;  %v824_v54 = vand.u32 2147483648, %v1641_v13 }
  0xc4   :  { %v796_v9 = vsel %vm1680_vm14, %v795_v16, %v791_v6  ;;  %846 = vst [vmem:[%s1764_s2 + $0x18] sm:$0xff] %v781_v43  ;;  %v802_v36 = vadd.f32 %v940_v46, %v801_v31  ;;  %vm818_vm8 = vweird.f32 %v1641_v13  ;;  %vm819_vm9 = vweird.f32 %v942_v4 }
  0xc5   :  { %847 = vst [vmem:[%s1764_s2 + $0x20] sm:$0xff] %v796_v9  ;;  %v815_v58 = vsub.f32 1.0, %v814_v26  ;;  %v822_v10 = vand.u32 2147483647, %v1641_v13  ;;  %vm820_vm10 = vmor %vm818_vm8, %vm819_vm9  ;;  %v825_v56 = vor.u32 1.1754944e-38, %v824_v54  ;;  %v839_v22 = vand.u32 2147483648, %v1648_v39 }
  0xc6   :  { %v806_v61 = vsel %vm805_vm6, %v940_v46, %v802_v36  ;;  %vm833_vm12 = vweird.f32 %v1648_v39  ;;  %v837_v13 = vand.u32 2147483647, %v1648_v39 }
  0xc7   :  { %v944_v38 = vpop.eup %943  ;;  %v811_v41 = vsel %vm808_vm7, %v810_v32, %v806_v61  ;;  %v816_v47 = vmul.f32 %v942_v4, %v815_v58  ;;  %vm823_vm11 = vcmp.eq.f32.partialorder %v822_v10, 8.507059e+37  ;;  %v840_v29 = vor.u32 1.1754944e-38, %v839_v22 }
  0xc8   :  { %v829_v40 = vmul.f32 %v944_v38, %v1648_v39  ;;  %848 = vst [vmem:[%s1764_s2 + $0x28] sm:$0xff] %v811_v41  ;;  %vm834_vm13 = vweird.f32 %v944_v38  ;;  %vm838_vm15 = vcmp.eq.f32.partialorder %v837_v13, 8.507059e+37 }
  0xc9   :  { %v817_v25 = vadd.f32 %v942_v4, %v816_v47  ;;  %vm835_vm14 = vmor %vm833_vm12, %vm834_vm13 }
  0xca   :  { %v830_v34 = vsub.f32 1.0, %v829_v40 }
  0xcb   :  { %v821_v50 = vsel %vm820_vm10, %v942_v4, %v817_v25 }
  0xcc   :  { %v826_v59 = vsel %vm823_vm11, %v825_v56, %v821_v50  ;;  %v831_v27 = vmul.f32 %v944_v38, %v830_v34 }
  0xcd   :  { %849 = vst [vmem:[%s1764_s2 + $0x30] sm:$0xff] %v826_v59 }
  0xce   :  { %v832_v33 = vadd.f32 %v944_v38, %v831_v27 }
  0xd0   :  { %v836_v1 = vsel %vm835_vm14, %v944_v38, %v832_v33 }
  0xd1   :  { %v841_v3 = vsel %vm838_vm15, %v840_v29, %v836_v1 }
  0xd2   :  { %850 = vst [vmem:[%s1764_s2 + $0x38] sm:$0xff] %v841_v3 }
  0xd3   :  { %855 = vsyncpa [#allocation3], 1 }

</bundles_post_ra>
